<compile_context>
chip_gen: v5e
topology: v5e:2x2
jax: 0.10.0
libtpu: 0.0.40
codegen_flags: <defaults>
</compile_context>

<pallas_src>
import functools

import jax
import jax.numpy as jnp
from jax import lax
from jax.experimental import pallas as pl
from jax.experimental.pallas import tpu as pltpu


def _round_up(x, m):
    return (x + m - 1) // m * m


# ----------------------------------------------------------------------------
# Fused kernel: one grid step processes S scenes (S*N polyline rows).
#   x  [S*N, D_in] --MLP--> h [S*N, H] --(agent-query self-attn + residual)--> a [S, H]
#   a  --decoder MLP--> out [S, OUT_PAD]
# ----------------------------------------------------------------------------
def _encoder_decoder_kernel(
    x_ref,                        # (S*N, D_in)  f32
    len_ref,                      # (S, 1)       int32  per-scene valid-polyline counts
    w1_ref, b1_ref,               # (D_in, H) bf16, (1, H) f32
    w2_ref, b2_ref,               # (H, H)    bf16, (1, H) f32
    wq_ref,                       # (H, H)    bf16   (1/sqrt(H) already folded in)
    wkv_ref,                      # (H, 2H)   bf16   K|V concatenated -> one MXU pass
    wd1_ref, bd1_ref,             # (H, H)    bf16, (1, H) f32
    wd2_ref, bd2_ref,             # (H, OUT_PAD) bf16, (1, OUT_PAD) f32
    o_ref,                        # (S, OUT_PAD) f32
    *, hidden, n_poly, scenes,
):
    f32, bf16 = jnp.float32, jnp.bfloat16
    SN = scenes * n_poly

    # ---- VectorNet per-polyline MLP over all S*N rows (bf16 operands, f32 accumulate) ----
    x = x_ref[...]                                                        # (SN, D_in) f32
    h = jnp.dot(x.astype(bf16), w1_ref[...], preferred_element_type=f32) + b1_ref[...]
    h = jnp.maximum(h, 0.0)
    h = jnp.dot(h.astype(bf16), w2_ref[...], preferred_element_type=f32) + b2_ref[...]
    h = jnp.maximum(h, 0.0)                                               # (SN, H) f32

    # ---- K/V for every polyline (single concatenated projection) ----
    kv = jnp.dot(h.astype(bf16), wkv_ref[...], preferred_element_type=f32)   # (SN, 2H) f32
    k = kv[:, :hidden].astype(bf16)
    v = kv[:, hidden:].astype(bf16)

    # Shared iotas for the agent gather and the attention mask.
    row = lax.broadcasted_iota(jnp.int32, (scenes, SN), 0)                # scene index in block
    col = lax.broadcasted_iota(jnp.int32, (scenes, SN), 1)                # flat polyline column
    lo = row * n_poly                                                     # first column of scene

    # ---- Gather agent (polyline 0 of each scene) hidden state via a one-hot matmul ----
    sel = (col == lo).astype(f32)                                         # (S, SN) one-hot rows
    h_agent = jnp.dot(sel, h, preferred_element_type=f32)                 # (S, H) f32

    # ---- Agent-query self attention over the scene's polylines ----
    q = jnp.dot(h_agent.astype(bf16), wq_ref[...], preferred_element_type=f32)   # (S, H)
    # q @ k^T without materializing a transpose of k:
    s = lax.dot_general(q.astype(bf16), k, (((1,), (1,)), ((), ())),
                        preferred_element_type=f32)                      # (S, SN)

    # Block-diagonal + padding mask: scene i attends columns [i*N, i*N + len_i).
    lens = len_ref[...]                                                   # (S, 1) int32
    valid = (col >= lo) & (col < lo + lens)
    s = jnp.where(valid, s, -1e9)

    s = s - jnp.max(s, axis=-1, keepdims=True)
    p = jnp.exp(s)
    p = p * pl.reciprocal(jnp.sum(p, axis=-1, keepdims=True), approx=False)

    attn = jnp.dot(p.astype(bf16), v, preferred_element_type=f32) + h_agent      # (S, H) f32

    # ---- Decoder MLP head on the agents ----
    z = jnp.dot(attn.astype(bf16), wd1_ref[...], preferred_element_type=f32) + bd1_ref[...]
    z = jnp.maximum(z, 0.0)
    out = jnp.dot(z.astype(bf16), wd2_ref[...], preferred_element_type=f32) + bd2_ref[...]
    o_ref[...] = out                                                      # (S, OUT_PAD) dense store


def fused_encoder_decoder(x, lengths, params, out_pad, scenes_per_step=None):
    B, N, D_in = x.shape
    H = params["w2"].shape[1]

    # Scenes per grid step: target ~256 rows (good MXU fill on v6e/v7x, >=128 on v5e).
    if scenes_per_step is None:
        scenes_per_step = max(1, min(B, max(1, 256 // N)))
    S = scenes_per_step
    B_pad = _round_up(B, S)
    # (8,128) tiling constraint on the flattened-row block.
    assert (S * N) % 8 == 0 or B_pad == S, "pick S so S*N is a multiple of 8"

    if B_pad != B:
        x = jnp.pad(x, ((0, B_pad - B), (0, 0), (0, 0)))
        lengths = jnp.pad(lengths, (0, B_pad - B))          # length 0 -> fully masked scene
    x2d = x.reshape(B_pad * N, D_in)
    lens2d = lengths.astype(jnp.int32).reshape(B_pad, 1)

    kernel = functools.partial(_encoder_decoder_kernel, hidden=H, n_poly=N, scenes=S)
    full = lambda g: (0, 0)
    out = pl.pallas_call(
        kernel,
        out_shape=jax.ShapeDtypeStruct((B_pad, out_pad), jnp.float32),
        grid_spec=pltpu.PrefetchScalarGridSpec(
            num_scalar_prefetch=0,
            grid=(B_pad // S,),
            in_specs=[
                pl.BlockSpec((S * N, D_in), lambda g: (g, 0)),     # x rows for S scenes
                pl.BlockSpec((S, 1), lambda g: (g, 0)),            # per-scene lengths
                pl.BlockSpec((D_in, H), full),                     # w1
                pl.BlockSpec((1, H), full),                        # b1
                pl.BlockSpec((H, H), full),                        # w2
                pl.BlockSpec((1, H), full),                        # b2
                pl.BlockSpec((H, H), full),                        # wq (scale folded)
                pl.BlockSpec((H, 2 * H), full),                    # wkv
                pl.BlockSpec((H, H), full),                        # wd1
                pl.BlockSpec((1, H), full),                        # bd1
                pl.BlockSpec((H, out_pad), full),                  # wd2
                pl.BlockSpec((1, out_pad), full),                  # bd2
            ],
            out_specs=pl.BlockSpec((S, out_pad), lambda g: (g, 0)),
        ),
        compiler_params=pltpu.CompilerParams(
            # Independent scene blocks; on v7x consider pltpu.CORE_PARALLEL to force an
            # explicit split of the grid across the two TensorCores.
            dimension_semantics=("parallel",),
            vmem_limit_bytes=32 * 1024 * 1024,
        ),
    )(x2d, lens2d,
      params["w1"], params["b1"], params["w2"], params["b2"],
      params["wq"], params["wkv"],
      params["wd1"], params["bd1"], params["wd2"], params["bd2"])
    return out[:B]


# ----------------------------------------------------------------------------
# Parameter init (deterministic, xavier_uniform for dim>1 params, zero biases).
# Weights stored bf16 (MXU operands); biases stay f32 (added post-accumulation).
# ----------------------------------------------------------------------------
def _xavier(key, shape):
    fan_in, fan_out = shape[0], shape[1]
    bound = (6.0 / (fan_in + fan_out)) ** 0.5
    return jax.random.uniform(key, shape, jnp.float32, -bound, bound)


def init_params(key, d_in, hidden, out_dim, out_pad):
    ks = jax.random.split(key, 7)
    bf16 = jnp.bfloat16
    # Fold the 1/sqrt(H) attention scale into the Q projection (one-time host transform).
    wq = _xavier(ks[2], (hidden, hidden)) * (1.0 / hidden ** 0.5)
    wk = _xavier(ks[3], (hidden, hidden))
    wv = _xavier(ks[4], (hidden, hidden))
    wd2 = _xavier(ks[6], (hidden, out_dim))
    wd2_pad = jnp.zeros((hidden, out_pad), jnp.float32).at[:, :out_dim].set(wd2)
    return {
        # encoder per-polyline MLP
        "w1": _xavier(ks[0], (d_in, hidden)).astype(bf16),
        "b1": jnp.zeros((1, hidden), jnp.float32),
        "w2": _xavier(ks[1], (hidden, hidden)).astype(bf16),
        "b2": jnp.zeros((1, hidden), jnp.float32),
        # global-graph attention: Q separate (agent rows only), K|V concatenated
        "wq": wq.astype(bf16),
        "wkv": jnp.concatenate([wk, wv], axis=1).astype(bf16),
        # decoder MLP head (output lane-padded to out_pad; extra columns are zero)
        "wd1": _xavier(ks[5], (hidden, hidden)).astype(bf16),
        "bd1": jnp.zeros((1, hidden), jnp.float32),
        "wd2": wd2_pad.astype(bf16),
        "bd2": jnp.zeros((1, out_pad), jnp.float32),
    }


# ----------------------------------------------------------------------------
# Full forward: EncoderDecoder(mapping) -> (trajectories, mode scores)
# ----------------------------------------------------------------------------
def encoder_decoder_forward(params, x, lengths, num_modes, horizon, out_pad):
    B = x.shape[0]
    out_padded = fused_encoder_decoder(x, lengths, params, out_pad)       # [B, OUT_PAD]
    out_dim = num_modes * horizon * 2 + num_modes
    out = out_padded[:, :out_dim]
    traj = out[:, : num_modes * horizon * 2].reshape(B, num_modes, horizon, 2)
    scores = jax.nn.log_softmax(out[:, num_modes * horizon * 2:], axis=-1)  # [B, K]
    return traj, scores


if __name__ == "__main__":
    # Small shapes consistent with the module: hidden_size=128 (module default),
    # 8 scenes, 16 polylines/scene, 32 raw polyline features -> one 128-row block per step.
    B, N, D_in, H = 8, 16, 32, 128
    K, T = 6, 12                              # num_modes, prediction horizon
    out_dim = K * T * 2 + K                   # 150
    out_pad = _round_up(out_dim, 128)         # 256 (lane-dense store)

    key = jax.random.PRNGKey(0)
    k_param, k_x = jax.random.split(key)
    params = init_params(k_param, D_in, H, out_dim, out_pad)

    x = jax.random.normal(k_x, (B, N, D_in), jnp.float32)
    lengths = jnp.array([16, 12, 16, 9, 16, 16, 5, 16], jnp.int32)   # inputs_lengths (padded scenes)

    fwd = jax.jit(functools.partial(
        encoder_decoder_forward, num_modes=K, horizon=T, out_pad=out_pad))
    traj, scores = fwd(params, x, lengths)
    jax.block_until_ready((traj, scores))

    assert traj.shape == (B, K, T, 2) and scores.shape == (B, K)
    assert bool(jnp.all(jnp.isfinite(traj))) and bool(jnp.all(jnp.isfinite(scores)))
    print("KERNEL_OK")
</pallas_src>

<mosaic_0001>
module attributes {stable_mosaic.version = 11 : i64} {
  func.func @_encoder_decoder_kernel(%arg0: i32, %arg1: memref<128x32xf32, #tpu.memory_space<vmem>>, %arg2: memref<8x1xi32, #tpu.memory_space<vmem>>, %arg3: memref<32x128xbf16, #tpu.memory_space<vmem>>, %arg4: memref<1x128xf32, #tpu.memory_space<vmem>>, %arg5: memref<128x128xbf16, #tpu.memory_space<vmem>>, %arg6: memref<1x128xf32, #tpu.memory_space<vmem>>, %arg7: memref<128x128xbf16, #tpu.memory_space<vmem>>, %arg8: memref<128x256xbf16, #tpu.memory_space<vmem>>, %arg9: memref<128x128xbf16, #tpu.memory_space<vmem>>, %arg10: memref<1x128xf32, #tpu.memory_space<vmem>>, %arg11: memref<128x256xbf16, #tpu.memory_space<vmem>>, %arg12: memref<1x256xf32, #tpu.memory_space<vmem>>, %arg13: memref<8x256xf32, #tpu.memory_space<vmem>>) attributes {dimension_semantics = [#tpu.dimension_semantics<parallel>], iteration_bounds = array<i64: 1>, scalar_prefetch = 0 : i64, scratch_operands = 0 : i64, tpu.core_type = #tpu.core_type<tc>, window_params = [{transform_indices = @transform_0, window_bounds = array<i64: 128, 32>}, {transform_indices = @transform_1, window_bounds = array<i64: 8, 1>}, {pipeline_mode = #tpu.pipeline_mode<synchronous>, transform_indices = @transform_2, window_bounds = array<i64: 32, 128>}, {pipeline_mode = #tpu.pipeline_mode<synchronous>, transform_indices = @transform_3, window_bounds = array<i64: 1, 128>}, {pipeline_mode = #tpu.pipeline_mode<synchronous>, transform_indices = @transform_4, window_bounds = array<i64: 128, 128>}, {pipeline_mode = #tpu.pipeline_mode<synchronous>, transform_indices = @transform_5, window_bounds = array<i64: 1, 128>}, {pipeline_mode = #tpu.pipeline_mode<synchronous>, transform_indices = @transform_6, window_bounds = array<i64: 128, 128>}, {pipeline_mode = #tpu.pipeline_mode<synchronous>, transform_indices = @transform_7, window_bounds = array<i64: 128, 256>}, {pipeline_mode = #tpu.pipeline_mode<synchronous>, transform_indices = @transform_8, window_bounds = array<i64: 128, 128>}, {pipeline_mode = #tpu.pipeline_mode<synchronous>, transform_indices = @transform_9, window_bounds = array<i64: 1, 128>}, {pipeline_mode = #tpu.pipeline_mode<synchronous>, transform_indices = @transform_10, window_bounds = array<i64: 128, 256>}, {pipeline_mode = #tpu.pipeline_mode<synchronous>, transform_indices = @transform_11, window_bounds = array<i64: 1, 256>}, {transform_indices = @transform_12, window_bounds = array<i64: 8, 256>}]} {
    %c0 = arith.constant 0 : index
    %c0_0 = arith.constant 0 : index
    %0 = vector.load %arg1[%c0, %c0_0] : memref<128x32xf32, #tpu.memory_space<vmem>>, vector<128x32xf32>
    %1 = arith.truncf %0 : vector<128x32xf32> to vector<128x32xbf16>
    %c0_1 = arith.constant 0 : index
    %c0_2 = arith.constant 0 : index
    %2 = vector.load %arg3[%c0_1, %c0_2] : memref<32x128xbf16, #tpu.memory_space<vmem>>, vector<32x128xbf16>
    %cst = arith.constant dense<0.000000e+00> : vector<128x128xf32>
    %3 = tpu.matmul %1, %2, %cst {dimension_numbers = #tpu.dot_dimension_numbers<[1], [0], [0], [1], [0, 0, 1, 1], [], []>} : vector<128x32xbf16>, vector<32x128xbf16>, vector<128x128xf32> -> vector<128x128xf32>
    %c0_3 = arith.constant 0 : index
    %c0_4 = arith.constant 0 : index
    %4 = vector.load %arg4[%c0_3, %c0_4] : memref<1x128xf32, #tpu.memory_space<vmem>>, vector<1x128xf32>
    %5 = vector.broadcast %4 : vector<1x128xf32> to vector<128x128xf32>
    %6 = arith.addf %3, %5 : vector<128x128xf32>
    %cst_5 = arith.constant 0.000000e+00 : f32
    %7 = vector.broadcast %cst_5 : f32 to vector<128x128xf32>
    %8 = arith.maximumf %6, %7 : vector<128x128xf32>
    %9 = arith.truncf %8 : vector<128x128xf32> to vector<128x128xbf16>
    %c0_6 = arith.constant 0 : index
    %c0_7 = arith.constant 0 : index
    %10 = vector.load %arg5[%c0_6, %c0_7] : memref<128x128xbf16, #tpu.memory_space<vmem>>, vector<128x128xbf16>
    %cst_8 = arith.constant dense<0.000000e+00> : vector<128x128xf32>
    %11 = tpu.matmul %9, %10, %cst_8 {dimension_numbers = #tpu.dot_dimension_numbers<[1], [0], [0], [1], [0, 0, 1, 1], [], []>} : vector<128x128xbf16>, vector<128x128xbf16>, vector<128x128xf32> -> vector<128x128xf32>
    %c0_9 = arith.constant 0 : index
    %c0_10 = arith.constant 0 : index
    %12 = vector.load %arg6[%c0_9, %c0_10] : memref<1x128xf32, #tpu.memory_space<vmem>>, vector<1x128xf32>
    %13 = vector.broadcast %12 : vector<1x128xf32> to vector<128x128xf32>
    %14 = arith.addf %11, %13 : vector<128x128xf32>
    %cst_11 = arith.constant 0.000000e+00 : f32
    %15 = vector.broadcast %cst_11 : f32 to vector<128x128xf32>
    %16 = arith.maximumf %14, %15 : vector<128x128xf32>
    %17 = arith.truncf %16 : vector<128x128xf32> to vector<128x128xbf16>
    %c0_12 = arith.constant 0 : index
    %c0_13 = arith.constant 0 : index
    %18 = vector.load %arg8[%c0_12, %c0_13] : memref<128x256xbf16, #tpu.memory_space<vmem>>, vector<128x256xbf16>
    %cst_14 = arith.constant dense<0.000000e+00> : vector<128x256xf32>
    %19 = tpu.matmul %17, %18, %cst_14 {dimension_numbers = #tpu.dot_dimension_numbers<[1], [0], [0], [1], [0, 0, 1, 1], [], []>} : vector<128x128xbf16>, vector<128x256xbf16>, vector<128x256xf32> -> vector<128x256xf32>
    %20 = vector.extract_strided_slice %19 {offsets = [0, 0], sizes = [128, 128], strides = [1, 1]} : vector<128x256xf32> to vector<128x128xf32>
    %21 = arith.truncf %20 : vector<128x128xf32> to vector<128x128xbf16>
    %22 = vector.extract_strided_slice %19 {offsets = [0, 128], sizes = [128, 128], strides = [1, 1]} : vector<128x256xf32> to vector<128x128xf32>
    %23 = arith.truncf %22 : vector<128x128xf32> to vector<128x128xbf16>
    %24 = tpu.iota {dimensions = array<i32: 0>} : vector<8x128xi32>
    %25 = tpu.iota {dimensions = array<i32: 1>} : vector<8x128xi32>
    %c16_i32 = arith.constant 16 : i32
    %26 = vector.broadcast %c16_i32 : i32 to vector<8x128xi32>
    %27 = arith.muli %24, %26 : vector<8x128xi32>
    %28 = arith.cmpi eq, %25, %27 : vector<8x128xi32>
    %29 = arith.extui %28 : vector<8x128xi1> to vector<8x128xi32>
    %30 = arith.sitofp %29 : vector<8x128xi32> to vector<8x128xf32>
    %cst_15 = arith.constant dense<0.000000e+00> : vector<8x128xf32>
    %31 = tpu.matmul %30, %16, %cst_15 {dimension_numbers = #tpu.dot_dimension_numbers<[1], [0], [0], [1], [0, 0, 1, 1], [], []>} : vector<8x128xf32>, vector<128x128xf32>, vector<8x128xf32> -> vector<8x128xf32>
    %32 = arith.truncf %31 : vector<8x128xf32> to vector<8x128xbf16>
    %c0_16 = arith.constant 0 : index
    %c0_17 = arith.constant 0 : index
    %33 = vector.load %arg7[%c0_16, %c0_17] : memref<128x128xbf16, #tpu.memory_space<vmem>>, vector<128x128xbf16>
    %cst_18 = arith.constant dense<0.000000e+00> : vector<8x128xf32>
    %34 = tpu.matmul %32, %33, %cst_18 {dimension_numbers = #tpu.dot_dimension_numbers<[1], [0], [0], [1], [0, 0, 1, 1], [], []>} : vector<8x128xbf16>, vector<128x128xbf16>, vector<8x128xf32> -> vector<8x128xf32>
    %35 = arith.truncf %34 : vector<8x128xf32> to vector<8x128xbf16>
    %cst_19 = arith.constant dense<0.000000e+00> : vector<8x128xf32>
    %36 = tpu.matmul %35, %21, %cst_19 {dimension_numbers = #tpu.dot_dimension_numbers<[1], [1], [0], [0], [0, 0, 1, 0], [], []>} : vector<8x128xbf16>, vector<128x128xbf16>, vector<8x128xf32> -> vector<8x128xf32>
    %c0_20 = arith.constant 0 : index
    %c0_21 = arith.constant 0 : index
    %37 = vector.load %arg2[%c0_20, %c0_21] : memref<8x1xi32, #tpu.memory_space<vmem>>, vector<8x1xi32>
    %38 = arith.cmpi sge, %25, %27 : vector<8x128xi32>
    %39 = vector.broadcast %37 : vector<8x1xi32> to vector<8x128xi32>
    %40 = arith.addi %27, %39 : vector<8x128xi32>
    %41 = arith.cmpi slt, %25, %40 : vector<8x128xi32>
    %42 = arith.andi %38, %41 : vector<8x128xi1>
    %cst_22 = arith.constant -1.000000e+09 : f32
    %43 = vector.broadcast %cst_22 : f32 to vector<8x128xf32>
    %44 = arith.select %42, %36, %43 : vector<8x128xi1>, vector<8x128xf32>
    %cst_23 = arith.constant dense<0xFF800000> : vector<8xf32>
    %45 = vector.multi_reduction <maximumf>, %44, %cst_23 [1] : vector<8x128xf32> to vector<8xf32>
    %46 = vector.shape_cast %45 : vector<8xf32> to vector<8x1xf32>
    %47 = vector.broadcast %46 : vector<8x1xf32> to vector<8x128xf32>
    %48 = arith.subf %44, %47 : vector<8x128xf32>
    %49 = math.exp %48 : vector<8x128xf32>
    %cst_24 = arith.constant dense<0.000000e+00> : vector<8xf32>
    %50 = vector.multi_reduction <add>, %49, %cst_24 [1] : vector<8x128xf32> to vector<8xf32>
    %51 = vector.shape_cast %50 : vector<8xf32> to vector<8x1xf32>
    %52 = tpu.reciprocal %51 : vector<8x1xf32> -> vector<8x1xf32>
    %53 = vector.broadcast %52 : vector<8x1xf32> to vector<8x128xf32>
    %54 = arith.mulf %49, %53 : vector<8x128xf32>
    %55 = arith.truncf %54 : vector<8x128xf32> to vector<8x128xbf16>
    %cst_25 = arith.constant dense<0.000000e+00> : vector<8x128xf32>
    %56 = tpu.matmul %55, %23, %cst_25 {dimension_numbers = #tpu.dot_dimension_numbers<[1], [0], [0], [1], [0, 0, 1, 1], [], []>} : vector<8x128xbf16>, vector<128x128xbf16>, vector<8x128xf32> -> vector<8x128xf32>
    %57 = arith.addf %56, %31 : vector<8x128xf32>
    %58 = arith.truncf %57 : vector<8x128xf32> to vector<8x128xbf16>
    %c0_26 = arith.constant 0 : index
    %c0_27 = arith.constant 0 : index
    %59 = vector.load %arg9[%c0_26, %c0_27] : memref<128x128xbf16, #tpu.memory_space<vmem>>, vector<128x128xbf16>
    %cst_28 = arith.constant dense<0.000000e+00> : vector<8x128xf32>
    %60 = tpu.matmul %58, %59, %cst_28 {dimension_numbers = #tpu.dot_dimension_numbers<[1], [0], [0], [1], [0, 0, 1, 1], [], []>} : vector<8x128xbf16>, vector<128x128xbf16>, vector<8x128xf32> -> vector<8x128xf32>
    %c0_29 = arith.constant 0 : index
    %c0_30 = arith.constant 0 : index
    %61 = vector.load %arg10[%c0_29, %c0_30] : memref<1x128xf32, #tpu.memory_space<vmem>>, vector<1x128xf32>
    %62 = vector.broadcast %61 : vector<1x128xf32> to vector<8x128xf32>
    %63 = arith.addf %60, %62 : vector<8x128xf32>
    %cst_31 = arith.constant 0.000000e+00 : f32
    %64 = vector.broadcast %cst_31 : f32 to vector<8x128xf32>
    %65 = arith.maximumf %63, %64 : vector<8x128xf32>
    %66 = arith.truncf %65 : vector<8x128xf32> to vector<8x128xbf16>
    %c0_32 = arith.constant 0 : index
    %c0_33 = arith.constant 0 : index
    %67 = vector.load %arg11[%c0_32, %c0_33] : memref<128x256xbf16, #tpu.memory_space<vmem>>, vector<128x256xbf16>
    %cst_34 = arith.constant dense<0.000000e+00> : vector<8x256xf32>
    %68 = tpu.matmul %66, %67, %cst_34 {dimension_numbers = #tpu.dot_dimension_numbers<[1], [0], [0], [1], [0, 0, 1, 1], [], []>} : vector<8x128xbf16>, vector<128x256xbf16>, vector<8x256xf32> -> vector<8x256xf32>
    %c0_35 = arith.constant 0 : index
    %c0_36 = arith.constant 0 : index
    %69 = vector.load %arg12[%c0_35, %c0_36] : memref<1x256xf32, #tpu.memory_space<vmem>>, vector<1x256xf32>
    %70 = vector.broadcast %69 : vector<1x256xf32> to vector<8x256xf32>
    %71 = arith.addf %68, %70 : vector<8x256xf32>
    %c0_37 = arith.constant 0 : index
    %c0_38 = arith.constant 0 : index
    %72 = vector.load %arg13[%c0_37, %c0_38] : memref<8x256xf32, #tpu.memory_space<vmem>>, vector<8x256xf32>
    tpu.vector_store %arg13[%c0_37, %c0_38], %71 {strides = array<i32>} : memref<8x256xf32, #tpu.memory_space<vmem>>, vector<8x256xf32>,
    return
  }
  func.func @transform_0(%arg0: i32) -> (i32, i32) {
    %c0_i32 = arith.constant 0 : i32
    %c0_i32_0 = arith.constant 0 : i32
    return %arg0, %c0_i32 : i32, i32
  }
  func.func @transform_1(%arg0: i32) -> (i32, i32) {
    %c0_i32 = arith.constant 0 : i32
    %c0_i32_0 = arith.constant 0 : i32
    return %arg0, %c0_i32 : i32, i32
  }
  func.func @transform_2(%arg0: i32) -> (i32, i32) {
    %c0_i32 = arith.constant 0 : i32
    %c0_i32_0 = arith.constant 0 : i32
    %c0_i32_1 = arith.constant 0 : i32
    return %c0_i32, %c0_i32_0 : i32, i32
  }
  func.func @transform_3(%arg0: i32) -> (i32, i32) {
    %c0_i32 = arith.constant 0 : i32
    %c0_i32_0 = arith.constant 0 : i32
    %c0_i32_1 = arith.constant 0 : i32
    return %c0_i32, %c0_i32_0 : i32, i32
  }
  func.func @transform_4(%arg0: i32) -> (i32, i32) {
    %c0_i32 = arith.constant 0 : i32
    %c0_i32_0 = arith.constant 0 : i32
    %c0_i32_1 = arith.constant 0 : i32
    return %c0_i32, %c0_i32_0 : i32, i32
  }
  func.func @transform_5(%arg0: i32) -> (i32, i32) {
    %c0_i32 = arith.constant 0 : i32
    %c0_i32_0 = arith.constant 0 : i32
    %c0_i32_1 = arith.constant 0 : i32
    return %c0_i32, %c0_i32_0 : i32, i32
  }
  func.func @transform_6(%arg0: i32) -> (i32, i32) {
    %c0_i32 = arith.constant 0 : i32
    %c0_i32_0 = arith.constant 0 : i32
    %c0_i32_1 = arith.constant 0 : i32
    return %c0_i32, %c0_i32_0 : i32, i32
  }
  func.func @transform_7(%arg0: i32) -> (i32, i32) {
    %c0_i32 = arith.constant 0 : i32
    %c0_i32_0 = arith.constant 0 : i32
    %c0_i32_1 = arith.constant 0 : i32
    return %c0_i32, %c0_i32_0 : i32, i32
  }
  func.func @transform_8(%arg0: i32) -> (i32, i32) {
    %c0_i32 = arith.constant 0 : i32
    %c0_i32_0 = arith.constant 0 : i32
    %c0_i32_1 = arith.constant 0 : i32
    return %c0_i32, %c0_i32_0 : i32, i32
  }
  func.func @transform_9(%arg0: i32) -> (i32, i32) {
    %c0_i32 = arith.constant 0 : i32
    %c0_i32_0 = arith.constant 0 : i32
    %c0_i32_1 = arith.constant 0 : i32
    return %c0_i32, %c0_i32_0 : i32, i32
  }
  func.func @transform_10(%arg0: i32) -> (i32, i32) {
    %c0_i32 = arith.constant 0 : i32
    %c0_i32_0 = arith.constant 0 : i32
    %c0_i32_1 = arith.constant 0 : i32
    return %c0_i32, %c0_i32_0 : i32, i32
  }
  func.func @transform_11(%arg0: i32) -> (i32, i32) {
    %c0_i32 = arith.constant 0 : i32
    %c0_i32_0 = arith.constant 0 : i32
    %c0_i32_1 = arith.constant 0 : i32
    return %c0_i32, %c0_i32_0 : i32, i32
  }
  func.func @transform_12(%arg0: i32) -> (i32, i32) {
    %c0_i32 = arith.constant 0 : i32
    %c0_i32_0 = arith.constant 0 : i32
    return %arg0, %c0_i32 : i32, i32
  }
}

</mosaic_0001>

<bundles_post_ra>
// kernel: encoder_decoder_forward.1
= control target key start
LH: loop header
LB: loop body
LE: loop exit
PB: predicated region body
PF: predicated region fallthrough
CT: control target
= control target key end

     0   :  { %17 = vsyncpa [#allocation3], 0  ;;  %s1799_s0 = inlined_call_operand.hbm [shape: f32[128,32], index: 0, kind: input, shape index: {}]   ;;  %s1800_s1 = inlined_call_operand.vmem [shape: s32[8,1], index: 1, kind: input, shape index: {}]   ;;  %s1801_s2 = inlined_call_operand.hbm [shape: bf16[32,128], index: 2, kind: input, shape index: {}]   ;;  %s1802_s3 = inlined_call_operand.vmem [shape: f32[1,128], index: 3, kind: input, shape index: {}]   ;;  %s1803_s4 = inlined_call_operand.hbm [shape: bf16[128,128], index: 4, kind: input, shape index: {}]   ;;  %s1804_s5 = inlined_call_operand.vmem [shape: f32[1,128], index: 5, kind: input, shape index: {}]   ;;  %s1805_s6 = inlined_call_operand.hbm [shape: bf16[128,128], index: 6, kind: input, shape index: {}]   ;;  %s1806_s7 = inlined_call_operand.hbm [shape: bf16[128,256], index: 7, kind: input, shape index: {}]   ;;  %s1807_s8 = inlined_call_operand.hbm [shape: bf16[128,128], index: 8, kind: input, shape index: {}]   ;;  %s1808_s9 = inlined_call_operand.vmem [shape: f32[1,128], index: 9, kind: input, shape index: {}]   ;;  %s1809_s10 = inlined_call_operand.hbm [shape: bf16[128,256], index: 10, kind: input, shape index: {}]   ;;  %s1810_s11 = inlined_call_operand.vmem [shape: f32[1,256], index: 11, kind: input, shape index: {}]   ;;  %s1811_s12 = inlined_call_operand.vmem [shape: f32[8,256], index: 12, kind: output, shape index: {}]  }
   0x1   :  { %18 = vsyncpa [#allocation5], 0 }
   0x2   :  { %19 = vsyncpa [#allocation8], 0  ;;  %s40_s23 = sshll.u32 %s1801_s2, 4  ;;  %s41_s23 = int_to_ptr.hbm [resolvable:$true] %s40_s23 }
   0x3   :  { %20 = vsyncpa [#allocation11], 0  ;;  %s1528_s24 = smov [#allocation4]   ;;  %s70_s28 = sshll.u32 %s1805_s6, 4  ;;  %s71_s28 = int_to_ptr.hbm [resolvable:$true] %s70_s28 }
   0x4   :  { %s42_s25 = sshll.u32 %s1528_s24, 4  ;;  %s1529_s29 = smov 64   ;;  %s43_s25 = int_to_ptr.vmem [resolvable:$true] %s42_s25 }
   0x5   :  { %s1530_s30 = smov 4   ;;  %s1531_s13 = smov [#allocation7]  }
   0x6   :  { %48 = dma.hbm_to_vmem [thread:$0]  %s41_s23, 256, %s43_s25, [#allocation5], %s1529_s29, %s1529_s29, %s1530_s30  }
   0x7   :  { %s72_s14 = sshll.u32 %s1531_s13, 4  ;;  %s96_s16 = sshll.u32 %s1807_s8, 4  ;;  %s73_s14 = int_to_ptr.vmem [resolvable:$true] %s72_s14  ;;  %s97_s16 = int_to_ptr.hbm [resolvable:$true] %s96_s16 }
   0x8   :  { %78 = dma.hbm_to_vmem [thread:$0]  %s71_s28, 1024, %s73_s14, [#allocation8], %s1529_s29, %s1529_s29, %s1530_s30  }
   0x9   :  { %s25_s18 = sshll.u32 %s1799_s0, 4  ;;  %s1532_s19 = smov [#allocation10]   ;;  %s26_s18 = int_to_ptr.hbm [resolvable:$true] %s25_s18 }
   0xa   :  { %s98_s20 = sshll.u32 %s1532_s19, 4  ;;  %s1533_s21 = smov [#allocation2]   ;;  %s99_s20 = int_to_ptr.vmem [resolvable:$true] %s98_s20 }
   0xb   :  { %104 = dma.hbm_to_vmem [thread:$0]  %s97_s16, 1024, %s99_s20, [#allocation11], %s1529_s29, %s1529_s29, %s1530_s30  }
   0xc   :  { %s27_s8 = sshll.u32 %s1533_s21, 4  ;;  %s1534_s22 = smov 128   ;;  %s28_s8 = int_to_ptr.vmem [resolvable:$true] %s27_s8 }
   0xd   :  { %s1535_s23 = smov 8   ;;  %s55_s26 = sshll.u32 %s1803_s4, 4  ;;  %s56_s26 = int_to_ptr.hbm [resolvable:$true] %s55_s26 }
   0xe   :  { %33 = dma.hbm_to_vmem [thread:$0]  %s26_s18, 2048, %s28_s8, [#allocation3], %s1534_s22, %s1534_s22, %s1535_s23  }
   0xf   :  { %s1536_s0 = smov [#allocation6]   ;;  %s83_s14 = sshll.u32 %s1806_s7, 4  ;;  %s84_s14 = int_to_ptr.hbm [resolvable:$true] %s83_s14 }
  0x10   :  { %s57_s27 = sshll.u32 %s1536_s0, 4  ;;  %s1537_s15 = smov [#allocation9]   ;;  %s58_s27 = int_to_ptr.vmem [resolvable:$true] %s57_s27 }
  0x11   :  { %63 = dma.hbm_to_vmem [thread:$0]  %s56_s26, 1024, %s58_s27, [#allocation5], %s1529_s29, %s1529_s29, %s1530_s30  }
  0x12   :  { %s85_s2 = sshll.u32 %s1537_s15, 4  ;;  %s111_s17 = sshll.u32 %s1809_s10, 4  ;;  %s86_s2 = int_to_ptr.vmem [resolvable:$true] %s85_s2  ;;  %s112_s17 = int_to_ptr.hbm [resolvable:$true] %s111_s17 }
  0x13   :  { %91 = dma.hbm_to_vmem [thread:$0]  %s84_s14, 2048, %s86_s2, [#allocation8], %s1534_s22, %s1534_s22, %s1535_s23  }
  0x14   :  { %s1538_s4 = smov [#allocation12]  }
  0x15   :  { %s113_s18 = sshll.u32 %s1538_s4, 4  ;;  %s114_s18 = int_to_ptr.vmem [resolvable:$true] %s113_s18 }
  0x16   :  { %119 = dma.hbm_to_vmem [thread:$0]  %s112_s17, 2048, %s114_s18, [#allocation11], %s1534_s22, %s1534_s22, %s1535_s23  }
  0x17   :  { %1520 = dma.done.wait [#allocation3], 2048  }
  0x18   :  { %1521 = vsyncadd [#allocation3], 4294965248 }
  0x19   :  { %1522 = dma.done.wait [#allocation5], 1280  }
  0x1a   :  { %1523 = vsyncadd [#allocation5], 4294966016 }
  0x1b   :  { %1524 = dma.done.wait [#allocation8], 3072  }
  0x1c   :  { %1525 = vsyncadd [#allocation8], 4294964224 }
  0x1d   :  { %1526 = dma.done.wait [#allocation11], 3072  }
  0x1e   :  { %1527 = vsyncadd [#allocation11], 4294964224  ;;  %v1274_v0 = vld [vmem:[#allocation4 + $0x8] sm:$0xff]  ;;  %v1273_v1 = vld [vmem:[#allocation4] sm:$0xff]  ;;  %vm195_vm0 = vcmask 261120  }
  0x1f   :  { %226 = vmatpush.bf16.msra.mxu0 %v1274_v0  ;;  %v151_v2 = vld [vmem:[#allocation2] sm:$0xff]  ;;  %v152_v3 = vld [vmem:[#allocation2 + $0x8] sm:$0xff]  ;;  %v153_v5 = vld [vmem:[#allocation2 + $0x10] sm:$0xff] }
  0x20   :  { %v167_v4 = vpack.c.bf16 %v152_v3, %v151_v2  ;;  %v154_v6 = vld [vmem:[#allocation2 + $0x18] sm:$0xff]  ;;  %v155_v8 = vld [vmem:[#allocation2 + $0x20] sm:$0xff]  ;;  %v156_v9 = vld [vmem:[#allocation2 + $0x28] sm:$0xff] }
  0x21   :  { %v168_v7 = vpack.c.bf16 %v154_v6, %v153_v5  ;;  %v169_v10 = vpack.c.bf16 %v156_v9, %v155_v8  ;;  %v157_v11 = vld [vmem:[#allocation2 + $0x30] sm:$0xff]  ;;  %v158_v12 = vld [vmem:[#allocation2 + $0x38] sm:$0xff]  ;;  %v159_v14 = vld [vmem:[#allocation2 + $0x40] sm:$0xff] }
  0x22   :  { %v170_v13 = vpack.c.bf16 %v158_v12, %v157_v11  ;;  %v160_v15 = vld [vmem:[#allocation2 + $0x48] sm:$0xff]  ;;  %v161_v18 = vld [vmem:[#allocation2 + $0x50] sm:$0xff]  ;;  %v162_v19 = vld [vmem:[#allocation2 + $0x58] sm:$0xff] }
  0x23   :  { %227 = vmatpush.bf16.msra.mxu0 %v1273_v1  ;;  %v171_v16 = vpack.c.bf16 %v160_v15, %v159_v14  ;;  %v1282_v17 = vld [vmem:[#allocation6 + $0x38] sm:$0xff]  ;;  %v172_v20 = vpack.c.bf16 %v162_v19, %v161_v18  ;;  %v1281_v21 = vld [vmem:[#allocation6 + $0x30] sm:$0xff]  ;;  %v1280_v22 = vld [vmem:[#allocation6 + $0x28] sm:$0xff] }
  0x24   :  { %361 = vmatpush.bf16.msra.mxu1 %v1282_v17  ;;  %v1279_v23 = vld [vmem:[#allocation6 + $0x20] sm:$0xff]  ;;  %v163_v24 = vld [vmem:[#allocation2 + $0x60] sm:$0xff]  ;;  %v164_v25 = vld [vmem:[#allocation2 + $0x68] sm:$0xff] }
  0x25   :  { %v1278_v26 = vld [vmem:[#allocation6 + $0x18] sm:$0xff]  ;;  %v173_v27 = vpack.c.bf16 %v164_v25, %v163_v24  ;;  %v1277_v28 = vld [vmem:[#allocation6 + $0x10] sm:$0xff]  ;;  %v1276_v29 = vld [vmem:[#allocation6 + $0x8] sm:$0xff] }
  0x26   :  { %1039 = vmatmul.msk.bf16.vlgmr.msra.gmra.mxu0 %vm195_vm0, %v167_v4  ;;  %v1275_v30 = vld [vmem:[#allocation6] sm:$0xff]  ;;  %v166_v32 = vld [vmem:[#allocation2 + $0x78] sm:$0xff]  ;;  %v1650_v35 = vld [vmem:[%s1802_s3] ss:$0 sm:$0xff] }
  0x27   :  { %v165_v31 = vld [vmem:[#allocation2 + $0x70] sm:$0xff]  ;;  %v1298_v11 = vld [vmem:[#allocation9 + $0x74] sm:$0xf0]  ;;  %v1297_v12 = vld [vmem:[#allocation9 + $0x74] sm:$0xf] }
  0x28   :  { %362 = vmatpush.bf16.msra.mxu1 %v1281_v21  ;;  %v174_v33 = vpack.c.bf16 %v166_v32, %v165_v31  ;;  %v1139_v14 = vld [vmem:[#allocation9 + $0x78] sm:$0xf0]  ;;  %v1129_v19 = vld [vmem:[#allocation9 + $0x60] sm:$0xf]  ;;  %v1295_v21 = vld [vmem:[#allocation9 + $0x64] sm:$0xf] }
  0x29   :  { %v1142_v17 = vor.u32 %v1297_v12, %v1139_v14  ;;  %v1121_v25 = vld [vmem:[#allocation9 + $0x50] sm:$0xf]  ;;  %v1113_v32 = vld [vmem:[#allocation9 + $0x40] sm:$0xf] }
  0x2b   :  { %579 = vmatpush.bf16.msra.mxu3 %v1142_v17 }
  0x2c   :  { %363 = vmatpush.bf16.msra.mxu1 %v1280_v22 }
  0x30   :  { %364 = vmatpush.bf16.msra.mxu1 %v1279_v23  ;;  %v1131_v23 = vld [vmem:[#allocation9 + $0x68] sm:$0xf0] }
  0x31   :  { %v1134_v24 = vor.u32 %v1295_v21, %v1131_v23 }
  0x33   :  { %580 = vmatpush.bf16.msra.mxu3 %v1134_v24 }
  0x34   :  { %365 = vmatpush.bf16.msra.mxu1 %v1278_v26  ;;  %v1294_v26 = vld [vmem:[#allocation9 + $0x54] sm:$0xf0] }
  0x36   :  { %1040 = vmatmul.msk.bf16.gmra.mxu0 %vm195_vm0, %v168_v7 }
  0x38   :  { %366 = vmatpush.bf16.msra.mxu1 %v1277_v28 }
  0x3c   :  { %367 = vmatpush.bf16.msra.mxu1 %v1276_v29  ;;  %v1122_v29 = vor.u32 %v1294_v26, %v1121_v25 }
  0x40   :  { %368 = vmatpush.bf16.msra.mxu1 %v1275_v30  ;;  %v1123_v30 = vld [vmem:[#allocation9 + $0x58] sm:$0xf0] }
  0x46   :  { %1041 = vmatmul.msk.bf16.gmra.mxu0 %vm195_vm0, %v169_v10  ;;  %v1137_v10 = vld [vmem:[#allocation9 + $0x70] sm:$0xf] }
  0x56   :  { %1042 = vmatmul.msk.bf16.gmra.mxu0 %vm195_vm0, %v170_v13  ;;  %v1138_v13 = vor.u32 %v1298_v11, %v1137_v10 }
  0x58   :  { %530 = vmatpush.bf16.msra.mxu2 %v1138_v13  ;;  %v1671_v13 = vld [vmem:[%s1804_s5] ss:$0 sm:$0xff] }
  0x66   :  { %1043 = vmatmul.msk.bf16.gmra.mxu0 %vm195_vm0, %v171_v16 }
  0x76   :  { %1044 = vmatmul.msk.bf16.gmra.mxu0 %vm195_vm0, %v172_v20  ;;  %v1296_v20 = vld [vmem:[#allocation9 + $0x64] sm:$0xf0] }
  0x77   :  { %v1130_v22 = vor.u32 %v1296_v20, %v1129_v19 }
  0x79   :  { %531 = vmatpush.bf16.msra.mxu2 %v1130_v22 }
  0x7d   :  { %532 = vmatpush.bf16.msra.mxu2 %v1122_v29 }
  0x86   :  { %1045 = vmatmul.msk.bf16.gmra.mxu0 %vm195_vm0, %v173_v27  ;;  %v1293_v27 = vld [vmem:[#allocation9 + $0x54] sm:$0xf] }
  0x87   :  { %v1126_v31 = vor.u32 %v1293_v27, %v1123_v30 }
  0x89   :  { %581 = vmatpush.bf16.msra.mxu3 %v1126_v31 }
  0x96   :  { %1046 = vmatmul.msk.bf16.gmra.mxu0 %vm195_vm0, %v174_v33  ;;  %v1292_v33 = vld [vmem:[#allocation9 + $0x44] sm:$0xf0] }
  0xa3   :  { %v229_v34 = vpop.f32.mrf.mxu0 }
  0xa4   :  { %v230_v36 = vadd.f32 %v1650_v35, %v229_v34  ;;  %v1291_v34 = vld [vmem:[#allocation9 + $0x44] sm:$0xf] }
  0xa6   :  { %v269_v39 = vmax.f32 %v230_v36, 0.0  ;;  %v1115_v36 = vld [vmem:[#allocation9 + $0x48] sm:$0xf0] }
  0xab   :  { %v231_v37 = vpop.f32.mrf.mxu0 }
  0xac   :  { %v232_v38 = vadd.f32 %v1650_v35, %v231_v37  ;;  %v1114_v37 = vor.u32 %v1292_v33, %v1113_v32 }
  0xae   :  { %v270_v40 = vmax.f32 %v232_v38, 0.0  ;;  %v1118_v38 = vor.u32 %v1291_v34, %v1115_v36  ;;  %533 = vmatpush.bf16.msra.mxu2 %v1114_v37 }
  0xb0   :  { %v285_v41 = vpack.c.bf16 %v270_v40, %v269_v39  ;;  %582 = vmatpush.bf16.msra.mxu3 %v1118_v38 }
  0xb2   :  { %369 = vmatmul.bf16.vlgmr.msra.gmra.mxu1 %v285_v41 }
  0xb3   :  { %v234_v42 = vpop.f32.mrf.mxu0 }
  0xb4   :  { %v235_v43 = vadd.f32 %v1650_v35, %v234_v42  ;;  %v1105_v42 = vld [vmem:[#allocation9 + $0x30] sm:$0xf] }
  0xb6   :  { %v271_v46 = vmax.f32 %v235_v43, 0.0  ;;  %v1290_v43 = vld [vmem:[#allocation9 + $0x34] sm:$0xf0] }
  0xbb   :  { %v236_v44 = vpop.f32.mrf.mxu0 }
  0xbc   :  { %v237_v45 = vadd.f32 %v1650_v35, %v236_v44  ;;  %v1289_v44 = vld [vmem:[#allocation9 + $0x34] sm:$0xf] }
  0xbe   :  { %v272_v47 = vmax.f32 %v237_v45, 0.0  ;;  %v1106_v45 = vor.u32 %v1290_v43, %v1105_v42 }
  0xc0   :  { %v286_v48 = vpack.c.bf16 %v272_v47, %v271_v46  ;;  %v1107_v46 = vld [vmem:[#allocation9 + $0x38] sm:$0xf0]  ;;  %534 = vmatpush.bf16.msra.mxu2 %v1106_v45 }
  0xc2   :  { %374 = vmatmul.bf16.gmra.mxu1 %v286_v48 }
  0xc3   :  { %v239_v49 = vpop.f32.mrf.mxu0 }
  0xc4   :  { %v240_v50 = vadd.f32 %v1650_v35, %v239_v49  ;;  %v1110_v49 = vor.u32 %v1289_v44, %v1107_v46 }
  0xc6   :  { %v273_v53 = vmax.f32 %v240_v50, 0.0  ;;  %583 = vmatpush.bf16.msra.mxu3 %v1110_v49 }
  0xcb   :  { %v241_v51 = vpop.f32.mrf.mxu0 }
  0xcc   :  { %v242_v52 = vadd.f32 %v1650_v35, %v241_v51  ;;  %v1097_v51 = vld [vmem:[#allocation9 + $0x20] sm:$0xf] }
  0xce   :  { %v274_v54 = vmax.f32 %v242_v52, 0.0  ;;  %v1288_v52 = vld [vmem:[#allocation9 + $0x24] sm:$0xf0] }
  0xd0   :  { %v287_v55 = vpack.c.bf16 %v274_v54, %v273_v53  ;;  %v1287_v53 = vld [vmem:[#allocation9 + $0x24] sm:$0xf]  ;;  %v1098_v54 = vor.u32 %v1288_v52, %v1097_v51 }
  0xd2   :  { %379 = vmatmul.bf16.gmra.mxu1 %v287_v55  ;;  %v1099_v55 = vld [vmem:[#allocation9 + $0x28] sm:$0xf0]  ;;  %535 = vmatpush.bf16.msra.mxu2 %v1098_v54 }
  0xd3   :  { %v244_v56 = vpop.f32.mrf.mxu0 }
  0xd4   :  { %v245_v57 = vadd.f32 %v1650_v35, %v244_v56  ;;  %v1102_v56 = vor.u32 %v1287_v53, %v1099_v55 }
  0xd6   :  { %v275_v60 = vmax.f32 %v245_v57, 0.0  ;;  %584 = vmatpush.bf16.msra.mxu3 %v1102_v56 }
  0xdb   :  { %v246_v58 = vpop.f32.mrf.mxu0 }
  0xdc   :  { %v247_v59 = vadd.f32 %v1650_v35, %v246_v58  ;;  %v1089_v58 = vld [vmem:[#allocation9 + $0x10] sm:$0xf] }
  0xde   :  { %v276_v61 = vmax.f32 %v247_v59, 0.0  ;;  %v1286_v59 = vld [vmem:[#allocation9 + $0x14] sm:$0xf0] }
  0xe0   :  { %v288_v62 = vpack.c.bf16 %v276_v61, %v275_v60  ;;  %v1285_v60 = vld [vmem:[#allocation9 + $0x14] sm:$0xf]  ;;  %v1090_v61 = vor.u32 %v1286_v59, %v1089_v58 }
  0xe2   :  { %384 = vmatmul.bf16.gmra.mxu1 %v288_v62  ;;  %v1091_v62 = vld [vmem:[#allocation9 + $0x18] sm:$0xf0]  ;;  %536 = vmatpush.bf16.msra.mxu2 %v1090_v61 }
  0xe3   :  { %v249_v63 = vpop.f32.mrf.mxu0 }
  0xe4   :  { %v250_v0 = vadd.f32 %v1650_v35, %v249_v63  ;;  %v1094_v63 = vor.u32 %v1285_v60, %v1091_v62 }
  0xe6   :  { %v277_v3 = vmax.f32 %v250_v0, 0.0  ;;  %585 = vmatpush.bf16.msra.mxu3 %v1094_v63  ;;  %v1081_v0 = vld [vmem:[#allocation9] sm:$0xf] }
  0xeb   :  { %v251_v1 = vpop.f32.mrf.mxu0 }
  0xec   :  { %v252_v2 = vadd.f32 %v1650_v35, %v251_v1  ;;  %v1284_v1 = vld [vmem:[#allocation9 + $0x4] sm:$0xf0] }
  0xee   :  { %v278_v4 = vmax.f32 %v252_v2, 0.0  ;;  %v1283_v2 = vld [vmem:[#allocation9 + $0x4] sm:$0xf] }
  0xf0   :  { %v289_v5 = vpack.c.bf16 %v278_v4, %v277_v3  ;;  %v1082_v3 = vor.u32 %v1284_v1, %v1081_v0  ;;  %v1083_v4 = vld [vmem:[#allocation9 + $0x8] sm:$0xf0] }
  0xf2   :  { %389 = vmatmul.bf16.gmra.mxu1 %v289_v5  ;;  %537 = vmatpush.bf16.msra.mxu2 %v1082_v3 }
  0xf3   :  { %v254_v6 = vpop.f32.mrf.mxu0 }
  0xf4   :  { %v255_v7 = vadd.f32 %v1650_v35, %v254_v6  ;;  %v1086_v6 = vor.u32 %v1283_v2, %v1083_v4 }
  0xf6   :  { %v279_v15 = vmax.f32 %v255_v7, 0.0  ;;  %586 = vmatpush.bf16.msra.mxu3 %v1086_v6 }
  0xfb   :  { %v256_v8 = vpop.f32.mrf.mxu0 }
  0xfc   :  { %v257_v9 = vadd.f32 %v1650_v35, %v256_v8 }
  0xfe   :  { %v280_v16 = vmax.f32 %v257_v9, 0.0 }
 0x100   :  { %v290_v18 = vpack.c.bf16 %v280_v16, %v279_v15 }
 0x102   :  { %394 = vmatmul.bf16.gmra.mxu1 %v290_v18 }
 0x103   :  { %v259_v28 = vpop.f32.mrf.mxu0 }
 0x104   :  { %v260_v39 = vadd.f32 %v1650_v35, %v259_v28 }
 0x106   :  { %v281_v47 = vmax.f32 %v260_v39, 0.0 }
 0x10b   :  { %v261_v40 = vpop.f32.mrf.mxu0 }
 0x10c   :  { %v262_v41 = vadd.f32 %v1650_v35, %v261_v40 }
 0x10e   :  { %v282_v48 = vmax.f32 %v262_v41, 0.0 }
 0x110   :  { %v291_v50 = vpack.c.bf16 %v282_v48, %v281_v47 }
 0x112   :  { %399 = vmatmul.bf16.gmra.mxu1 %v291_v50 }
 0x113   :  { %v264_v57 = vpop.f32.mrf.mxu0 }
 0x114   :  { %v265_v5 = vadd.f32 %v1650_v35, %v264_v57 }
 0x116   :  { %v283_v9 = vmax.f32 %v265_v5, 0.0  ;;  %v644_v5 = vlaneseq }
 0x11b   :  { %v266_v7 = vpop.f32.mrf.mxu0 }
 0x11c   :  { %v267_v8 = vadd.f32 %v1650_v35, %v266_v7 }
 0x11e   :  { %v284_v10 = vmax.f32 %v267_v8, 0.0  ;;  %v645_v8 = vshrl.u32 %v644_v5, 7 }
 0x120   :  { %v292_v11 = vpack.c.bf16 %v284_v10, %v283_v9  ;;  %v1722_v9 = vand.u32 127, %v644_v5  ;;  %v1724_v10 = vmul.u32 16, %v645_v8  ;;  %v1540_v5 = vmov 0  }
 0x121   :  { %1344 = vset.pattern.permute.xlu0 %v1540_v5 }
 0x122   :  { %404 = vmatmul.bf16.gmra.mxu1 %v292_v11  ;;  %vm649_vm1 = vcmp.eq.s32.totalorder %v1722_v9, %v1724_v10  ;;  %vm765_vm2 = vcmp.ge.s32.totalorder %v1722_v9, %v1724_v10 }
 0x12f   :  { %v370_v12 = vpop.f32.mrf.mxu1 }
 0x130   :  { %v1674_v14 = vadd.f32 %v1671_v13, %v370_v12 }
 0x132   :  { %v410_v35 = vmax.f32 %v1674_v14, 0.0 }
 0x137   :  { %v372_v15 = vpop.f32.mrf.mxu1 }
 0x138   :  { %v1677_v16 = vadd.f32 %v1671_v13, %v372_v15 }
 0x13a   :  { %v411_v17 = vmax.f32 %v1677_v16, 0.0 }
 0x13c   :  { %v426_v18 = vpack.c.bf16 %v411_v17, %v410_v35 }
 0x13e   :  { %538 = vmatmul.bf16.vlgmr.msra.gmra.mxu2 %v426_v18  ;;  %587 = vmatmul.bf16.vlgmr.msra.gmra.mxu3 %v426_v18  ;;  %v1539_v18 = vmov 1.0  }
 0x13f   :  { %v375_v19 = vpop.f32.mrf.mxu1 }
 0x140   :  { %v1686_v20 = vadd.f32 %v1671_v13, %v375_v19 }
 0x142   :  { %v412_v23 = vmax.f32 %v1686_v20, 0.0 }
 0x147   :  { %v377_v21 = vpop.f32.mrf.mxu1 }
 0x148   :  { %v1689_v22 = vadd.f32 %v1671_v13, %v377_v21 }
 0x14a   :  { %v413_v24 = vmax.f32 %v1689_v22, 0.0 }
 0x14c   :  { %v427_v25 = vpack.c.bf16 %v413_v24, %v412_v23 }
 0x14e   :  { %543 = vmatmul.bf16.gmra.mxu2 %v427_v25  ;;  %592 = vmatmul.bf16.gmra.mxu3 %v427_v25 }
 0x14f   :  { %v380_v26 = vpop.f32.mrf.mxu1 }
 0x150   :  { %v1698_v27 = vadd.f32 %v1671_v13, %v380_v26 }
 0x152   :  { %v414_v30 = vmax.f32 %v1698_v27, 0.0 }
 0x157   :  { %v382_v28 = vpop.f32.mrf.mxu1 }
 0x158   :  { %v383_v29 = vadd.f32 %v1671_v13, %v382_v28 }
 0x15a   :  { %v415_v31 = vmax.f32 %v383_v29, 0.0 }
 0x15c   :  { %v428_v32 = vpack.c.bf16 %v415_v31, %v414_v30 }
 0x15e   :  { %548 = vmatmul.bf16.gmra.mxu2 %v428_v32  ;;  %597 = vmatmul.bf16.gmra.mxu3 %v428_v32 }
 0x15f   :  { %v385_v33 = vpop.f32.mrf.mxu1 }
 0x160   :  { %v386_v34 = vadd.f32 %v1671_v13, %v385_v33 }
 0x162   :  { %v416_v38 = vmax.f32 %v386_v34, 0.0 }
 0x167   :  { %v387_v36 = vpop.f32.mrf.mxu1 }
 0x168   :  { %v388_v37 = vadd.f32 %v1671_v13, %v387_v36 }
 0x16a   :  { %v417_v39 = vmax.f32 %v388_v37, 0.0 }
 0x16c   :  { %v429_v40 = vpack.c.bf16 %v417_v39, %v416_v38 }
 0x16e   :  { %553 = vmatmul.bf16.gmra.mxu2 %v429_v40  ;;  %602 = vmatmul.bf16.gmra.mxu3 %v429_v40  ;;  %v1305_v40 = vld [vmem:[#allocation7 + $0x30] sm:$0xff] }
 0x16f   :  { %v390_v41 = vpop.f32.mrf.mxu1 }
 0x170   :  { %v391_v42 = vadd.f32 %v1671_v13, %v390_v41 }
 0x172   :  { %v418_v45 = vmax.f32 %v391_v42, 0.0 }
 0x177   :  { %v392_v43 = vpop.f32.mrf.mxu1 }
 0x178   :  { %v393_v44 = vadd.f32 %v1671_v13, %v392_v43  ;;  %v1304_v43 = vld [vmem:[#allocation7 + $0x28] sm:$0xff] }
 0x17a   :  { %v419_v46 = vmax.f32 %v393_v44, 0.0  ;;  %v1303_v44 = vld [vmem:[#allocation7 + $0x20] sm:$0xff] }
 0x17c   :  { %v430_v47 = vpack.c.bf16 %v419_v46, %v418_v45 }
 0x17e   :  { %558 = vmatmul.bf16.gmra.mxu2 %v430_v47  ;;  %607 = vmatmul.bf16.gmra.mxu3 %v430_v47  ;;  %v1302_v47 = vld [vmem:[#allocation7 + $0x18] sm:$0xff] }
 0x17f   :  { %v395_v48 = vpop.f32.mrf.mxu1 }
 0x180   :  { %v396_v49 = vadd.f32 %v1671_v13, %v395_v48  ;;  %v1301_v48 = vld [vmem:[#allocation7 + $0x10] sm:$0xff] }
 0x182   :  { %v420_v52 = vmax.f32 %v396_v49, 0.0  ;;  %v1300_v49 = vld [vmem:[#allocation7 + $0x8] sm:$0xff] }
 0x187   :  { %v397_v50 = vpop.f32.mrf.mxu1 }
 0x188   :  { %v398_v51 = vadd.f32 %v1671_v13, %v397_v50 }
 0x18a   :  { %v421_v53 = vmax.f32 %v398_v51, 0.0 }
 0x18c   :  { %v431_v54 = vpack.c.bf16 %v421_v53, %v420_v52 }
 0x18e   :  { %563 = vmatmul.bf16.gmra.mxu2 %v431_v54  ;;  %612 = vmatmul.bf16.gmra.mxu3 %v431_v54 }
 0x18f   :  { %v400_v55 = vpop.f32.mrf.mxu1 }
 0x190   :  { %v401_v56 = vadd.f32 %v1671_v13, %v400_v55 }
 0x192   :  { %v422_v59 = vmax.f32 %v401_v56, 0.0 }
 0x197   :  { %v402_v57 = vpop.f32.mrf.mxu1 }
 0x198   :  { %v403_v58 = vadd.f32 %v1671_v13, %v402_v57 }
 0x19a   :  { %v423_v60 = vmax.f32 %v403_v58, 0.0 }
 0x19c   :  { %v432_v61 = vpack.c.bf16 %v423_v60, %v422_v59 }
 0x19e   :  { %568 = vmatmul.bf16.gmra.mxu2 %v432_v61  ;;  %617 = vmatmul.bf16.gmra.mxu3 %v432_v61 }
 0x19f   :  { %v405_v62 = vpop.f32.mrf.mxu1 }
 0x1a0   :  { %v406_v63 = vadd.f32 %v1671_v13, %v405_v62 }
 0x1a2   :  { %v424_v2 = vmax.f32 %v406_v63, 0.0 }
 0x1a7   :  { %v407_v0 = vpop.f32.mrf.mxu1 }
 0x1a8   :  { %v408_v1 = vadd.f32 %v1671_v13, %v407_v0 }
 0x1aa   :  { %v425_v3 = vmax.f32 %v408_v1, 0.0 }
 0x1ac   :  { %652 = vmatpush.msrb.mxu0 %v425_v3  ;;  %v433_v4 = vpack.c.bf16 %v425_v3, %v424_v2 }
 0x1ae   :  { %573 = vmatmul.bf16.gmra.mxu2 %v433_v4  ;;  %622 = vmatmul.bf16.gmra.mxu3 %v433_v4  ;;  %v764_v4 = vld [vmem:[%s1800_s1] sm:$0xff] }
 0x1af   :  { %653 = vmatpush.msrb.mxu0 %v424_v2  ;;  %767 = vperm.xlu0 %1344, %v764_v4  }
 0x1b1   :  { %654 = vmatpush.msrb.mxu0 %v423_v60 }
 0x1b3   :  { %655 = vmatpush.msrb.mxu0 %v422_v59 }
 0x1b5   :  { %656 = vmatpush.msrb.mxu0 %v421_v53 }
 0x1b7   :  { %657 = vmatpush.msrb.mxu0 %v420_v52  ;;  %v1299_v52 = vld [vmem:[#allocation7] sm:$0xff] }
 0x1b9   :  { %658 = vmatpush.msrb.mxu0 %v419_v46 }
 0x1bb   :  { %659 = vmatpush.msrb.mxu0 %v418_v45 }
 0x1bd   :  { %660 = vmatpush.msrb.mxu0 %v417_v39  ;;  %v1306_v39 = vld [vmem:[#allocation7 + $0x38] sm:$0xff] }
 0x1be   :  { %737 = vmatpush.bf16.msrb.mxu1 %v1306_v39  ;;  %v1267_v39 = vld [vmem:[#allocation12 + $0x70] sm:$0xf] }
 0x1bf   :  { %661 = vmatpush.msrb.mxu0 %v416_v38 }
 0x1c1   :  { %662 = vmatpush.msrb.mxu0 %v415_v31  ;;  %v1714_v6 = vpop.f32.mrf.mxu2  ;;  %v1716_v7 = vpop.f32.mrf.mxu3 }
 0x1c2   :  { %738 = vmatpush.bf16.msrb.mxu1 %v1305_v40  ;;  %v1330_v40 = vld [vmem:[#allocation12 + $0x74] sm:$0xf0] }
 0x1c3   :  { %663 = vmatpush.msrb.mxu0 %v414_v30 }
 0x1c5   :  { %664 = vmatpush.msrb.mxu0 %v413_v24 }
 0x1c6   :  { %739 = vmatpush.bf16.msrb.mxu1 %v1304_v43  ;;  %v1269_v43 = vld [vmem:[#allocation12 + $0x78] sm:$0xf0] }
 0x1c7   :  { %665 = vmatpush.msrb.mxu0 %v412_v23 }
 0x1c9   :  { %666 = vmatpush.msrb.mxu0 %v411_v17  ;;  %v1730_v11 = vpop.f32.mrf.mxu2  ;;  %v1732_v12 = vpop.f32.mrf.mxu3 }
 0x1ca   :  { %v628_v13 = vpack.c.bf16 %v1730_v11, %v1714_v6  ;;  %v636_v15 = vpack.c.bf16 %v1732_v12, %v1716_v7  ;;  %740 = vmatpush.bf16.msrb.mxu1 %v1303_v44  ;;  %v1259_v44 = vld [vmem:[#allocation12 + $0x60] sm:$0xf] }
 0x1cb   :  { %667 = vmatpush.msrb.mxu0 %v410_v35 }
 0x1cc   :  { %1144 = vmatmul.msk.f32.vlgmr.msrb.gmra.mxu0 %vm649_vm1, %v1539_v18 }
 0x1ce   :  { %741 = vmatpush.bf16.msrb.mxu1 %v1302_v47  ;;  %v1327_v47 = vld [vmem:[#allocation12 + $0x64] sm:$0xf] }
 0x1d1   :  { %v1742_v16 = vpop.f32.mrf.mxu2  ;;  %v1744_v17 = vpop.f32.mrf.mxu3 }
 0x1d2   :  { %742 = vmatpush.bf16.msrb.mxu1 %v1301_v48  ;;  %v1261_v48 = vld [vmem:[#allocation12 + $0x68] sm:$0xf0] }
 0x1d6   :  { %743 = vmatpush.bf16.msrb.mxu1 %v1300_v49 }
 0x1d9   :  { %v1746_v19 = vpop.f32.mrf.mxu2  ;;  %v1748_v20 = vpop.f32.mrf.mxu3 }
 0x1da   :  { %v629_v21 = vpack.c.bf16 %v1746_v19, %v1742_v16  ;;  %v637_v22 = vpack.c.bf16 %v1748_v20, %v1744_v17  ;;  %744 = vmatpush.bf16.msrb.mxu1 %v1299_v52  ;;  %v1326_v52 = vld [vmem:[#allocation12 + $0x54] sm:$0xf0] }
 0x1e1   :  { %v1754_v23 = vpop.f32.mrf.mxu2  ;;  %v598_v14 = vpop.f32.mrf.mxu3 }
 0x1e9   :  { %v1756_v35 = vpop.f32.mrf.mxu2  ;;  %v600_v24 = vpop.f32.mrf.mxu3 }
 0x1ea   :  { %v630_v25 = vpack.c.bf16 %v1756_v35, %v1754_v23  ;;  %v638_v26 = vpack.c.bf16 %v600_v24, %v598_v14  ;;  %v1312_v23 = vld [vmem:[#allocation10 + $0x28] sm:$0xff] }
 0x1f1   :  { %v554_v27 = vpop.f32.mrf.mxu2  ;;  %v603_v28 = vpop.f32.mrf.mxu3 }
 0x1f9   :  { %v556_v29 = vpop.f32.mrf.mxu2  ;;  %v605_v30 = vpop.f32.mrf.mxu3 }
 0x1fa   :  { %v631_v31 = vpack.c.bf16 %v556_v29, %v554_v27  ;;  %v639_v32 = vpack.c.bf16 %v605_v30, %v603_v28  ;;  %v1308_v30 = vld [vmem:[#allocation10 + $0x8] sm:$0xff] }
 0x201   :  { %v559_v33 = vpop.f32.mrf.mxu2  ;;  %v608_v34 = vpop.f32.mrf.mxu3 }
 0x209   :  { %v561_v36 = vpop.f32.mrf.mxu2  ;;  %v610_v37 = vpop.f32.mrf.mxu3 }
 0x20a   :  { %v632_v38 = vpack.c.bf16 %v561_v36, %v559_v33  ;;  %v640_v0 = vpack.c.bf16 %v610_v37, %v608_v34 }
 0x211   :  { %v564_v41 = vpop.f32.mrf.mxu2  ;;  %v613_v42 = vpop.f32.mrf.mxu3 }
 0x219   :  { %v566_v45 = vpop.f32.mrf.mxu2  ;;  %v615_v46 = vpop.f32.mrf.mxu3 }
 0x21a   :  { %v641_v62 = vpack.c.bf16 %v615_v46, %v613_v42  ;;  %v633_v2 = vpack.c.bf16 %v566_v45, %v564_v41  ;;  %v1329_v41 = vld [vmem:[#allocation12 + $0x74] sm:$0xf]  ;;  %v1268_v42 = vor.u32 %v1330_v40, %v1267_v39  ;;  %v1328_v45 = vld [vmem:[#allocation12 + $0x64] sm:$0xf0] }
 0x21b   :  { %v1272_v46 = vor.u32 %v1329_v41, %v1269_v43  ;;  %v1260_v49 = vor.u32 %v1328_v45, %v1259_v44 }
 0x21c   :  { %995 = vmatpush.bf16.msra.mxu1 %v1268_v42 }
 0x220   :  { %996 = vmatpush.bf16.msra.mxu1 %v1260_v49 }
 0x221   :  { %v569_v50 = vpop.f32.mrf.mxu2  ;;  %v618_v51 = vpop.f32.mrf.mxu3 }
 0x229   :  { %v571_v53 = vpop.f32.mrf.mxu2  ;;  %v620_v54 = vpop.f32.mrf.mxu3 }
 0x22a   :  { %v642_v61 = vpack.c.bf16 %v620_v54, %v618_v51  ;;  %v634_v63 = vpack.c.bf16 %v571_v53, %v569_v50  ;;  %v1264_v50 = vor.u32 %v1327_v47, %v1261_v48  ;;  %v1251_v51 = vld [vmem:[#allocation12 + $0x50] sm:$0xf]  ;;  %v1325_v53 = vld [vmem:[#allocation12 + $0x54] sm:$0xf]  ;;  %v1253_v54 = vld [vmem:[#allocation12 + $0x58] sm:$0xf0] }
 0x231   :  { %v574_v55 = vpop.f32.mrf.mxu2  ;;  %v623_v56 = vpop.f32.mrf.mxu3 }
 0x239   :  { %v576_v57 = vpop.f32.mrf.mxu2  ;;  %v625_v58 = vpop.f32.mrf.mxu3 }
 0x23a   :  { %v635_v59 = vpack.c.bf16 %v576_v57, %v574_v55  ;;  %v643_v60 = vpack.c.bf16 %v625_v58, %v623_v56  ;;  %v1252_v55 = vor.u32 %v1326_v52, %v1251_v51  ;;  %v1256_v56 = vor.u32 %v1325_v53, %v1253_v54  ;;  %v1243_v57 = vld [vmem:[#allocation12 + $0x40] sm:$0xf]  ;;  %v1324_v58 = vld [vmem:[#allocation12 + $0x44] sm:$0xf0] }
 0x23c   :  { %751 = vmatpush.bf16.xpose.msrb.mxu2 %v635_v59  ;;  %796 = vmatpush.bf16.msrb.mxu3 %v643_v60  ;;  %v1323_v59 = vld [vmem:[#allocation12 + $0x44] sm:$0xf]  ;;  %v1245_v60 = vld [vmem:[#allocation12 + $0x48] sm:$0xf0] }
 0x23d   :  { %997 = vmatpush.bf16.msra.mxu1 %v1252_v55 }
 0x240   :  { %797 = vmatpush.bf16.msrb.mxu3 %v642_v61  ;;  %v1244_v61 = vor.u32 %v1324_v58, %v1243_v57 }
 0x242   :  { %998 = vmatpush.bf16.msra.mxu1 %v1244_v61 }
 0x244   :  { %752 = vmatpush.bf16.xpose.msrb.mxu2 %v634_v63  ;;  %798 = vmatpush.bf16.msrb.mxu3 %v641_v62  ;;  %v1248_v62 = vor.u32 %v1323_v59, %v1245_v60  ;;  %v1235_v63 = vld [vmem:[#allocation12 + $0x30] sm:$0xf] }
 0x248   :  { %799 = vmatpush.bf16.msrb.mxu3 %v640_v0  ;;  %v1322_v0 = vld [vmem:[#allocation12 + $0x34] sm:$0xf0] }
 0x249   :  { %v1760_v1 = vpop.f32.mrf.mxu0  ;;  %v1236_v4 = vor.u32 %v1322_v0, %v1235_v63 }
 0x24a   :  { %v672_v3 = vpack.c.bf16 %v1760_v1, %v1760_v1 }
 0x24b   :  { %999 = vmatpush.bf16.msra.mxu1 %v1236_v4 }
 0x24c   :  { %745 = vmatmul.bf16.vlgmr.msrb.gmra.mxu1 %v672_v3  ;;  %753 = vmatpush.bf16.xpose.msrb.mxu2 %v633_v2  ;;  %v1321_v2 = vld [vmem:[#allocation12 + $0x34] sm:$0xf]  ;;  %v1237_v3 = vld [vmem:[#allocation12 + $0x38] sm:$0xf0] }
 0x24d   :  { %800 = vmatpush.bf16.msrb.mxu3 %v639_v32  ;;  %v1240_v5 = vor.u32 %v1321_v2, %v1237_v3 }
 0x251   :  { %801 = vmatpush.bf16.msrb.mxu3 %v638_v26 }
 0x254   :  { %754 = vmatpush.bf16.xpose.msrb.mxu2 %v632_v38  ;;  %v1307_v38 = vld [vmem:[#allocation10] sm:$0xff] }
 0x255   :  { %802 = vmatpush.bf16.msrb.mxu3 %v637_v22  ;;  %v1313_v22 = vld [vmem:[#allocation10 + $0x30] sm:$0xff] }
 0x259   :  { %803 = vmatpush.bf16.msrb.mxu3 %v636_v15  ;;  %v768_v15 = vpop.permute.xlu0 %767 }
 0x25a   :  { %v769_v18 = vadd.s32 %v768_v15, %v1724_v10  ;;  %v1311_v10 = vld [vmem:[#allocation10 + $0x20] sm:$0xff]  ;;  %v1229_v15 = vld [vmem:[#allocation12 + $0x28] sm:$0xf0] }
 0x25c   :  { %755 = vmatpush.bf16.xpose.msrb.mxu2 %v631_v31  ;;  %vm770_vm3 = vcmp.lt.s32.totalorder %v1722_v9, %v769_v18  ;;  %v1310_v9 = vld [vmem:[#allocation10 + $0x18] sm:$0xff] }
 0x25d   :  { %vm771_vm4 = vmand %vm765_vm2, %vm770_vm3 }
 0x264   :  { %756 = vmatpush.bf16.xpose.msrb.mxu2 %v630_v25  ;;  %v1309_v25 = vld [vmem:[#allocation10 + $0x10] sm:$0xff] }
 0x26c   :  { %757 = vmatpush.bf16.xpose.msrb.mxu2 %v629_v21  ;;  %v1314_v21 = vld [vmem:[#allocation10 + $0x38] sm:$0xff] }
 0x26d   :  { %878 = vmatpush.bf16.msra.mxu0 %v1314_v21  ;;  %v1317_v21 = vld [vmem:[#allocation12 + $0x14] sm:$0xf] }
 0x271   :  { %879 = vmatpush.bf16.msra.mxu0 %v1313_v22 }
 0x274   :  { %758 = vmatpush.bf16.xpose.msrb.mxu2 %v628_v13 }
 0x275   :  { %880 = vmatpush.bf16.msra.mxu0 %v1312_v23  ;;  %v1221_v23 = vld [vmem:[#allocation12 + $0x18] sm:$0xf0] }
 0x279   :  { %881 = vmatpush.bf16.msra.mxu0 %v1311_v10  ;;  %v1211_v10 = vld [vmem:[#allocation12] sm:$0xf] }
 0x27c   :  { %1008 = vmatpush.bf16.msra.mxu2 %v1272_v46 }
 0x27d   :  { %882 = vmatpush.bf16.msra.mxu0 %v1310_v9  ;;  %v1316_v9 = vld [vmem:[#allocation12 + $0x4] sm:$0xf0] }
 0x280   :  { %1009 = vmatpush.bf16.msra.mxu2 %v1264_v50 }
 0x281   :  { %883 = vmatpush.bf16.msra.mxu0 %v1309_v25  ;;  %v1213_v25 = vld [vmem:[#allocation12 + $0x8] sm:$0xf0] }
 0x284   :  { %1010 = vmatpush.bf16.msra.mxu2 %v1256_v56 }
 0x285   :  { %884 = vmatpush.bf16.msra.mxu0 %v1308_v30 }
 0x288   :  { %1011 = vmatpush.bf16.msra.mxu2 %v1248_v62 }
 0x289   :  { %885 = vmatpush.bf16.msra.mxu0 %v1307_v38 }
 0x28c   :  { %1012 = vmatpush.bf16.msra.mxu2 %v1240_v5 }
 0x2c9   :  { %v746_v7 = vpop.f32.mrf.mxu1 }
 0x2ca   :  { %v750_v8 = vpack.c.bf16 %v746_v7, %v746_v7  ;;  %v1227_v7 = vld [vmem:[#allocation12 + $0x20] sm:$0xf] }
 0x2cc   :  { %759 = vmatmul.bf16.vlgmr.msrb.gmra.mxu2 %v750_v8  ;;  %v1320_v8 = vld [vmem:[#allocation12 + $0x24] sm:$0xf0] }
 0x2cd   :  { %v1228_v18 = vor.u32 %v1320_v8, %v1227_v7 }
 0x2cf   :  { %1000 = vmatpush.bf16.msra.mxu1 %v1228_v18 }
 0x2d1   :  { %v748_v12 = vpop.f32.mrf.mxu1 }
 0x2d2   :  { %v1319_v12 = vld [vmem:[#allocation12 + $0x24] sm:$0xf] }
 0x34f   :  { %v760_v6 = vpop.f32.mrf.mxu2 }
 0x350   :  { %v772_v11 = vsel %vm771_vm4, %v760_v6, -1e+09  ;;  %v1232_v6 = vor.u32 %v1319_v12, %v1229_v15 }
 0x351   :  { %773 = vmax.xlane.f32.xlu0 %v772_v11 }
 0x352   :  { %1013 = vmatpush.bf16.msra.mxu2 %v1232_v6 }
 0x357   :  { %v762_v13 = vpop.f32.mrf.mxu2 }
 0x3c4   :  { %v774_v16 = vpop.xlane.xlu0 %773 }
 0x3c5   :  { %v775_v17 = vsub.f32 %v772_v11, %v774_v16 }
 0x3c7   :  { %v776_v19 = vmul.f32 1.442695, %v775_v17 }
 0x3c9   :  { %1348 = vpow2.f32 %v776_v19  ;;  %v1219_v19 = vld [vmem:[#allocation12 + $0x10] sm:$0xf] }
 0x3cf   :  { %v1349_v20 = vpop.eup %1348 }
 0x3d0   :  { %778 = vadd.xlane.f32.xlu1 %v1349_v20 }
 0x443   :  { %v779_v14 = vpop.xlane.xlu1 %778 }
 0x444   :  { %1350 = vrcp.f32 %v779_v14  ;;  %v791_v27 = vand.u32 2147483648, %v779_v14  ;;  %v789_v29 = vand.u32 2147483647, %v779_v14  ;;  %vm785_vm6 = vweird.f32 %v779_v14 }
 0x446   :  { %v792_v32 = vor.u32 1.1754944e-38, %v791_v27  ;;  %vm790_vm8 = vcmp.eq.f32.partialorder %v789_v29, 8.507059e+37 }
 0x44a   :  { %v1351_v35 = vpop.eup %1350 }
 0x44b   :  { %v781_v24 = vmul.f32 %v1351_v35, %v779_v14  ;;  %vm786_vm5 = vweird.f32 %v1351_v35  ;;  %v1224_v14 = vor.u32 %v1317_v21, %v1221_v23 }
 0x44c   :  { %vm787_vm7 = vmor %vm785_vm6, %vm786_vm5 }
 0x44d   :  { %v782_v26 = vsub.f32 1.0, %v781_v24  ;;  %1014 = vmatpush.bf16.msra.mxu2 %v1224_v14  ;;  %v1212_v24 = vor.u32 %v1316_v9, %v1211_v10 }
 0x44f   :  { %v783_v28 = vmul.f32 %v1351_v35, %v782_v26 }
 0x451   :  { %v784_v31 = vadd.f32 %v1351_v35, %v783_v28 }
 0x453   :  { %v788_v33 = vsel %vm787_vm7, %v1351_v35, %v784_v31  ;;  %v1315_v35 = vld [vmem:[#allocation12 + $0x4] sm:$0xf] }
 0x454   :  { %v793_v34 = vsel %vm790_vm8, %v792_v32, %v788_v33  ;;  %v1216_v26 = vor.u32 %v1315_v35, %v1213_v25  ;;  %v909_v32 = vld [vmem:[%s1810_s11] sm:$0x3] }
 0x455   :  { %v794_v36 = vmul.f32 %v1349_v20, %v793_v34  ;;  %v1318_v20 = vld [vmem:[#allocation12 + $0x14] sm:$0xf0]  ;;  %v911_v33 = vperm.slane %v909_v32, 0 }
 0x456   :  { %v1220_v22 = vor.u32 %v1318_v20, %v1219_v19  ;;  %1015 = vmatpush.bf16.msra.mxu2 %v1216_v26 }
 0x457   :  { %v795_v37 = vpack.c.bf16 %v794_v36, %v794_v36 }
 0x458   :  { %1001 = vmatpush.bf16.msra.mxu1 %v1220_v22 }
 0x459   :  { %804 = vmatmul.bf16.vlgmr.msrb.gmra.mxu3 %v795_v37  ;;  %v912_v37 = vperm.slane %v909_v32, 1 }
 0x45c   :  { %1002 = vmatpush.bf16.msra.mxu1 %v1212_v24 }
 0x4dc   :  { %v805_v11 = vpop.f32.mrf.mxu3 }
 0x4dd   :  { %v806_v13 = vadd.f32 %v805_v11, %v1760_v1  ;;  %v1347_v1 = vld [vmem:[%s1808_s9] ss:$0 sm:$0xff] }
 0x4df   :  { %v809_v16 = vpack.c.bf16 %v806_v13, %v806_v13 }
 0x4e1   :  { %886 = vmatmul.bf16.vlgmr.msra.gmra.mxu0 %v809_v16 }
 0x4e4   :  { %v807_v17 = vpop.f32.mrf.mxu3 }
 0x55e   :  { %v887_v27 = vpop.f32.mrf.mxu0 }
 0x55f   :  { %v888_v28 = vadd.f32 %v1347_v1, %v887_v27 }
 0x561   :  { %v891_v29 = vmax.f32 %v888_v28, 0.0 }
 0x563   :  { %v892_v30 = vpack.c.bf16 %v891_v29, %v891_v29 }
 0x565   :  { %1003 = vmatmul.bf16.vlgmr.msra.gmra.mxu1 %v892_v30  ;;  %1016 = vmatmul.bf16.vlgmr.msra.gmra.mxu2 %v892_v30 }
 0x566   :  { %v889_v31 = vpop.f32.mrf.mxu0 }
 0x5e2   :  { %v1004_v34 = vpop.f32.mrf.mxu1 }
 0x5e3   :  { %v1005_v36 = vadd.f32 %v1004_v34, %v911_v33 }
 0x5e5   :  { %1021 = vst [vmem:[%s1811_s12] sm:$0xff] %v1005_v36 }
 0x5e8   :  { %v1017_v38 = vpop.f32.mrf.mxu2 }
 0x5e9   :  { %v1018_v39 = vadd.f32 %v1017_v38, %v912_v37 }
 0x5ea   :  { %v1006_v40 = vpop.f32.mrf.mxu1 }
 0x5eb   :  { %1022 = vst [vmem:[%s1811_s12 + $0x8] sm:$0xff] %v1018_v39 }
 0x5f0   :  { %v1019_v41 = vpop.f32.mrf.mxu2 }
 0x5f1   :  { %1027 = vsyncpa [#allocation3], 1 }
 0x5f2   :  { %1028 = vsyncpa [#allocation5], 1 }
 0x5f3   :  { %1029 = vsyncpa [#allocation8], 1 }
 0x5f4   :  { %1030 = vsyncpa [#allocation11], 1 }

</bundles_post_ra>
